<compile_context>
chip_gen: v7x
topology: tpu7x:2x2x1
jax: 0.10.0
libtpu: 0.0.40
codegen_flags: <defaults>
</compile_context>

<pallas_src>
import jax
import jax.numpy as jnp
from jax.experimental import pallas as pl
from jax.experimental.pallas import tpu as pltpu


def _elementwise_dtype():
    """bf16 rolls / mask-muls on chips with a native bf16 VPU (v6e / v7x);
    f32 elementwise (bf16 only for the MXU operand) on v5e and older."""
    try:
        kind = jax.devices()[0].device_kind.lower()
    except Exception:
        kind = ""
    if ("v6" in kind) or ("v7" in kind):
        return jnp.bfloat16
    return jnp.float32


def _make_kernel(H, W, ew_dtype):
    P = H * W
    # Tap t = kh*3 + kw corresponds to offset (dh, dw) = (kh-1, kw-1); the
    # shifted image at flattened position p holds x[p + dh*W + dw], i.e.
    # roll(x, -(dh*W + dw)) along the lane axis (boundary-masked afterwards).
    offsets = [(dh, dw) for dh in (-1, 0, 1) for dw in (-1, 0, 1)]
    shifts = [(-(dh * W + dw)) % P for dh, dw in offsets]

    def kernel(x_ref, w1_ref, w2_ref, b1_ref, b2_ref, out_ref, stk_ref):
        # x_ref:   (1, Cin, P)    f32  flattened NCHW input, one batch element
        # w1_ref:  (Cout, 9*Cin)  bf16 conv1 taps stacked along K, BN1 folded
        # w2_ref:  (Cout, 9*Cout) bf16 conv2 taps stacked along K, BN2 folded
        # b*_ref:  (Cout, 1)      f32  folded BN biases
        # out_ref: (1, Cout, P)   f32  lane-dense output block
        # stk_ref: (9*Cin, P)     bf16 staging buffer for the stacked taps
        x = x_ref[0]                                       # (Cin, P) f32

        # Zero 'SAME'-padding validity masks, built in-kernel from lane-index
        # compares (cheap VPU filler that hides under the MXU).
        pos = jax.lax.broadcasted_iota(jnp.int32, (1, P), 1)
        if (W & (W - 1)) == 0:
            ww = jnp.bitwise_and(pos, W - 1)               # pos % W (W pow2)
        else:
            ww = pos % W  # TODO(synk): non-pow2 W only appears at real ResNet
            #               sizes, which need the row-tiled mask path anyway.
        masks = []
        for dh, dw in offsets:
            if dh == 0 and dw == 0:
                masks.append(None)                         # centre tap
                continue
            conds = []
            if dh == -1:
                conds.append(pos >= W)                     # h-1 >= 0
            if dh == +1:
                conds.append(pos < (H - 1) * W)            # h+1 <  H
            if dw == -1:
                conds.append(ww >= 1)                      # w-1 >= 0
            if dw == +1:
                conds.append(ww <= W - 2)                  # w+1 <  W
            valid = conds[0]
            for c in conds[1:]:
                valid = valid & c
            masks.append(jnp.where(valid, 1.0, 0.0).astype(ew_dtype))  # (1,P)

        def conv3x3(inp_f32, w_ref):
            # (C, P) -> (Cout, P): one K = 9*C MXU matmul against the stacked
            # shifted+masked taps (no per-tap matmuls / f32 accumulator adds).
            c = inp_f32.shape[0]
            inp = inp_f32.astype(ew_dtype)                 # cast once
            for t, shift in enumerate(shifts):
                if masks[t] is None:
                    tap = inp                              # centre: no roll/mask
                else:
                    tap = pltpu.roll(inp, shift, 1) * masks[t]
                stk_ref[pl.ds(t * c, c), :] = tap.astype(stk_ref.dtype)
            return jnp.dot(w_ref[...], stk_ref[...],
                           preferred_element_type=jnp.float32)

        # conv1 -> bn1 -> relu   (standard BasicBlock intermediate ReLU)
        y1 = jnp.maximum(conv3x3(x, w1_ref) + b1_ref[...], 0.0)
        # conv2 -> bn2 -> + identity -> relu
        y2 = conv3x3(y1, w2_ref) + b2_ref[...]
        out_ref[0] = jnp.maximum(y2 + x, 0.0).astype(out_ref.dtype)

    return kernel


def bloco_residual(x_nchw, w1_oihw, w2_oihw, scale1, bias1, scale2, bias2):
    """x: (N,C,H,W) f32; w*: (Cout,Cin,3,3) f32 (PyTorch OIHW); scale/bias: (C,)."""
    N, C, H, W = x_nchw.shape
    C_out = w1_oihw.shape[0]
    assert C_out == C, "stride=1 / no-downsample block requires Cin == Cout"
    P = H * W  # 256 here -> lane-dense (multiple of 128) blocks

    x_flat = x_nchw.reshape(N, C, P)          # free reshape, no pad/transpose

    def fold(w, scale):
        # Fold BN scale, reorder to (Cout, 9*Cin) with column order
        # (tap-major, cin-minor), tap = kh*3 + kw, and cast to bf16.
        wf = w * scale[:, None, None, None]                # (Co, Ci, 3, 3)
        co, ci = wf.shape[0], wf.shape[1]
        return jnp.transpose(wf, (0, 2, 3, 1)).reshape(co, 9 * ci).astype(jnp.bfloat16)

    w1_t = fold(w1_oihw, scale1)
    w2_t = fold(w2_oihw, scale2)
    b1 = bias1.reshape(C_out, 1).astype(jnp.float32)
    b2 = bias2.reshape(C_out, 1).astype(jnp.float32)

    ew_dtype = _elementwise_dtype()

    out_flat = pl.pallas_call(
        _make_kernel(H, W, ew_dtype),
        out_shape=jax.ShapeDtypeStruct((N, C_out, P), jnp.float32),
        grid=(N,),
        in_specs=[
            pl.BlockSpec((1, C, P), lambda b: (b, 0, 0)),           # x
            pl.BlockSpec((C_out, 9 * C), lambda b: (0, 0)),         # w1 stacked
            pl.BlockSpec((C_out, 9 * C_out), lambda b: (0, 0)),     # w2 stacked
            pl.BlockSpec((C_out, 1), lambda b: (0, 0)),             # bias1
            pl.BlockSpec((C_out, 1), lambda b: (0, 0)),             # bias2
        ],
        out_specs=pl.BlockSpec((1, C_out, P), lambda b: (b, 0, 0)),
        scratch_shapes=[pltpu.VMEM((9 * C, P), jnp.bfloat16)],      # tap stack
        compiler_params=pltpu.CompilerParams(
            dimension_semantics=("parallel",)),
    )(x_flat, w1_t, w2_t, b1, b2)

    return out_flat.reshape(N, C_out, H, W)


def reference(x_nchw, w1, w2, scale1, bias1, scale2, bias2):
    """Plain-JAX reference with the same math as the kernel: eval-mode BN
    folded into the weights, bf16 conv operands, f32 accumulation, and the
    standard BasicBlock intermediate ReLU."""
    dn = ('NCHW', 'OIHW', 'NCHW')

    def conv_bn(x, w, scale, bias):
        wf = (w * scale[:, None, None, None]).astype(jnp.bfloat16)
        y = jax.lax.conv_general_dilated(
            x.astype(jnp.bfloat16), wf, (1, 1), 'SAME',
            dimension_numbers=dn, preferred_element_type=jnp.float32)
        return y + bias[None, :, None, None]

    y = jnp.maximum(conv_bn(x_nchw, w1, scale1, bias1), 0.0)
    y = conv_bn(y, w2, scale2, bias2)
    return jnp.maximum(y + x_nchw, 0.0)


if __name__ == "__main__":
    key = jax.random.PRNGKey(0)
    (kx, kw1, kw2, kg1, kb1, km1, kv1, kg2, kb2, km2, kv2) = jax.random.split(key, 11)

    N, C, H, W = 2, 4, 16, 16          # canais_entrada == canais_saida == 4
    eps = 1e-5

    x = jax.random.normal(kx, (N, C, H, W), jnp.float32)

    # Conv weights in PyTorch OIHW layout (Cout, Cin, 3, 3), no bias.
    w1 = jax.random.normal(kw1, (C, C, 3, 3), jnp.float32) * 0.1
    w2 = jax.random.normal(kw2, (C, C, 3, 3), jnp.float32) * 0.1

    # Deterministic synthetic eval-mode BatchNorm params, folded to scale/bias.
    gamma1 = 1.0 + 0.1 * jax.random.normal(kg1, (C,), jnp.float32)
    beta1 = 0.1 * jax.random.normal(kb1, (C,), jnp.float32)
    mean1 = 0.1 * jax.random.normal(km1, (C,), jnp.float32)
    var1 = 1.0 + 0.1 * jax.random.uniform(kv1, (C,), jnp.float32)
    gamma2 = 1.0 + 0.1 * jax.random.normal(kg2, (C,), jnp.float32)
    beta2 = 0.1 * jax.random.normal(kb2, (C,), jnp.float32)
    mean2 = 0.1 * jax.random.normal(km2, (C,), jnp.float32)
    var2 = 1.0 + 0.1 * jax.random.uniform(kv2, (C,), jnp.float32)

    scale1 = gamma1 / jnp.sqrt(var1 + eps)
    bias1 = beta1 - mean1 * scale1
    scale2 = gamma2 / jnp.sqrt(var2 + eps)
    bias2 = beta2 - mean2 * scale2

    out = bloco_residual(x, w1, w2, scale1, bias1, scale2, bias2)
    out = jax.block_until_ready(out)

    ref = reference(x, w1, w2, scale1, bias1, scale2, bias2)
    assert out.shape == (N, C, H, W)
    assert jnp.allclose(out, ref, atol=1e-2, rtol=1e-2), "mismatch vs reference"

    print("KERNEL_OK")
</pallas_src>

<mosaic_0001>
module attributes {stable_mosaic.version = 11 : i64} {
  func.func @kernel(%arg0: i32, %arg1: memref<1x4x256xf32, #tpu.memory_space<vmem>>, %arg2: memref<4x36xbf16, #tpu.memory_space<vmem>>, %arg3: memref<4x36xbf16, #tpu.memory_space<vmem>>, %arg4: memref<4x1xf32, #tpu.memory_space<vmem>>, %arg5: memref<4x1xf32, #tpu.memory_space<vmem>>, %arg6: memref<1x4x256xf32, #tpu.memory_space<vmem>>, %arg7: memref<36x256xbf16, #tpu.memory_space<vmem>>) attributes {dimension_semantics = [#tpu.dimension_semantics<parallel>], iteration_bounds = array<i64: 2>, scalar_prefetch = 0 : i64, scratch_operands = 1 : i64, tpu.core_type = #tpu.core_type<tc>, window_params = [{transform_indices = @transform_0, window_bounds = array<i64: 1, 4, 256>}, {pipeline_mode = #tpu.pipeline_mode<synchronous>, transform_indices = @transform_1, window_bounds = array<i64: 4, 36>}, {pipeline_mode = #tpu.pipeline_mode<synchronous>, transform_indices = @transform_2, window_bounds = array<i64: 4, 36>}, {pipeline_mode = #tpu.pipeline_mode<synchronous>, transform_indices = @transform_3, window_bounds = array<i64: 4, 1>}, {pipeline_mode = #tpu.pipeline_mode<synchronous>, transform_indices = @transform_4, window_bounds = array<i64: 4, 1>}, {transform_indices = @transform_5, window_bounds = array<i64: 1, 4, 256>}]} {
    %c0 = arith.constant 0 : index
    %c0_0 = arith.constant 0 : index
    %c0_1 = arith.constant 0 : index
    %0 = vector.load %arg1[%c0, %c0_0, %c0_1] : memref<1x4x256xf32, #tpu.memory_space<vmem>>, vector<1x4x256xf32>
    %1 = vector.shape_cast %0 : vector<1x4x256xf32> to vector<4x256xf32>
    %2 = tpu.iota {dimensions = array<i32: 1>} : vector<1x256xi32>
    %c15_i32 = arith.constant 15 : i32
    %3 = vector.broadcast %c15_i32 : i32 to vector<1x256xi32>
    %4 = arith.andi %2, %3 : vector<1x256xi32>
    %c16_i32 = arith.constant 16 : i32
    %5 = vector.broadcast %c16_i32 : i32 to vector<1x256xi32>
    %6 = arith.cmpi sge, %2, %5 : vector<1x256xi32>
    %c1_i32 = arith.constant 1 : i32
    %7 = vector.broadcast %c1_i32 : i32 to vector<1x256xi32>
    %8 = arith.cmpi sge, %4, %7 : vector<1x256xi32>
    %9 = arith.andi %6, %8 : vector<1x256xi1>
    %cst = arith.constant 1.000000e+00 : f32
    %cst_2 = arith.constant 0.000000e+00 : f32
    %10 = vector.broadcast %cst : f32 to vector<1x256xf32>
    %11 = vector.broadcast %cst_2 : f32 to vector<1x256xf32>
    %12 = arith.select %9, %10, %11 : vector<1x256xi1>, vector<1x256xf32>
    %c16_i32_3 = arith.constant 16 : i32
    %13 = vector.broadcast %c16_i32_3 : i32 to vector<1x256xi32>
    %14 = arith.cmpi sge, %2, %13 : vector<1x256xi32>
    %cst_4 = arith.constant 1.000000e+00 : f32
    %cst_5 = arith.constant 0.000000e+00 : f32
    %15 = vector.broadcast %cst_4 : f32 to vector<1x256xf32>
    %16 = vector.broadcast %cst_5 : f32 to vector<1x256xf32>
    %17 = arith.select %14, %15, %16 : vector<1x256xi1>, vector<1x256xf32>
    %c16_i32_6 = arith.constant 16 : i32
    %18 = vector.broadcast %c16_i32_6 : i32 to vector<1x256xi32>
    %19 = arith.cmpi sge, %2, %18 : vector<1x256xi32>
    %c14_i32 = arith.constant 14 : i32
    %20 = vector.broadcast %c14_i32 : i32 to vector<1x256xi32>
    %21 = arith.cmpi sle, %4, %20 : vector<1x256xi32>
    %22 = arith.andi %19, %21 : vector<1x256xi1>
    %cst_7 = arith.constant 1.000000e+00 : f32
    %cst_8 = arith.constant 0.000000e+00 : f32
    %23 = vector.broadcast %cst_7 : f32 to vector<1x256xf32>
    %24 = vector.broadcast %cst_8 : f32 to vector<1x256xf32>
    %25 = arith.select %22, %23, %24 : vector<1x256xi1>, vector<1x256xf32>
    %c1_i32_9 = arith.constant 1 : i32
    %26 = vector.broadcast %c1_i32_9 : i32 to vector<1x256xi32>
    %27 = arith.cmpi sge, %4, %26 : vector<1x256xi32>
    %cst_10 = arith.constant 1.000000e+00 : f32
    %cst_11 = arith.constant 0.000000e+00 : f32
    %28 = vector.broadcast %cst_10 : f32 to vector<1x256xf32>
    %29 = vector.broadcast %cst_11 : f32 to vector<1x256xf32>
    %30 = arith.select %27, %28, %29 : vector<1x256xi1>, vector<1x256xf32>
    %c14_i32_12 = arith.constant 14 : i32
    %31 = vector.broadcast %c14_i32_12 : i32 to vector<1x256xi32>
    %32 = arith.cmpi sle, %4, %31 : vector<1x256xi32>
    %cst_13 = arith.constant 1.000000e+00 : f32
    %cst_14 = arith.constant 0.000000e+00 : f32
    %33 = vector.broadcast %cst_13 : f32 to vector<1x256xf32>
    %34 = vector.broadcast %cst_14 : f32 to vector<1x256xf32>
    %35 = arith.select %32, %33, %34 : vector<1x256xi1>, vector<1x256xf32>
    %c240_i32 = arith.constant 240 : i32
    %36 = vector.broadcast %c240_i32 : i32 to vector<1x256xi32>
    %37 = arith.cmpi slt, %2, %36 : vector<1x256xi32>
    %c1_i32_15 = arith.constant 1 : i32
    %38 = vector.broadcast %c1_i32_15 : i32 to vector<1x256xi32>
    %39 = arith.cmpi sge, %4, %38 : vector<1x256xi32>
    %40 = arith.andi %37, %39 : vector<1x256xi1>
    %cst_16 = arith.constant 1.000000e+00 : f32
    %cst_17 = arith.constant 0.000000e+00 : f32
    %41 = vector.broadcast %cst_16 : f32 to vector<1x256xf32>
    %42 = vector.broadcast %cst_17 : f32 to vector<1x256xf32>
    %43 = arith.select %40, %41, %42 : vector<1x256xi1>, vector<1x256xf32>
    %c240_i32_18 = arith.constant 240 : i32
    %44 = vector.broadcast %c240_i32_18 : i32 to vector<1x256xi32>
    %45 = arith.cmpi slt, %2, %44 : vector<1x256xi32>
    %cst_19 = arith.constant 1.000000e+00 : f32
    %cst_20 = arith.constant 0.000000e+00 : f32
    %46 = vector.broadcast %cst_19 : f32 to vector<1x256xf32>
    %47 = vector.broadcast %cst_20 : f32 to vector<1x256xf32>
    %48 = arith.select %45, %46, %47 : vector<1x256xi1>, vector<1x256xf32>
    %c240_i32_21 = arith.constant 240 : i32
    %49 = vector.broadcast %c240_i32_21 : i32 to vector<1x256xi32>
    %50 = arith.cmpi slt, %2, %49 : vector<1x256xi32>
    %c14_i32_22 = arith.constant 14 : i32
    %51 = vector.broadcast %c14_i32_22 : i32 to vector<1x256xi32>
    %52 = arith.cmpi sle, %4, %51 : vector<1x256xi32>
    %53 = arith.andi %50, %52 : vector<1x256xi1>
    %cst_23 = arith.constant 1.000000e+00 : f32
    %cst_24 = arith.constant 0.000000e+00 : f32
    %54 = vector.broadcast %cst_23 : f32 to vector<1x256xf32>
    %55 = vector.broadcast %cst_24 : f32 to vector<1x256xf32>
    %56 = arith.select %53, %54, %55 : vector<1x256xi1>, vector<1x256xf32>
    %c17_i32 = arith.constant 17 : i32
    %57 = tpu.dynamic_rotate %1 by %c17_i32 dim 1 : vector<4x256xf32>, i32 -> vector<4x256xf32>
    %58 = vector.broadcast %12 : vector<1x256xf32> to vector<4x256xf32>
    %59 = arith.mulf %57, %58 : vector<4x256xf32>
    %60 = arith.truncf %59 : vector<4x256xf32> to vector<4x256xbf16>
    %c0_25 = arith.constant 0 : index
    %c0_26 = arith.constant 0 : index
    %61 = vector.load %arg7[%c0_25, %c0_26] : memref<36x256xbf16, #tpu.memory_space<vmem>>, vector<4x256xbf16>
    tpu.vector_store %arg7[%c0_25, %c0_26], %60 {strides = array<i32>} : memref<36x256xbf16, #tpu.memory_space<vmem>>, vector<4x256xbf16>,
    %c16_i32_27 = arith.constant 16 : i32
    %62 = tpu.dynamic_rotate %1 by %c16_i32_27 dim 1 : vector<4x256xf32>, i32 -> vector<4x256xf32>
    %63 = vector.broadcast %17 : vector<1x256xf32> to vector<4x256xf32>
    %64 = arith.mulf %62, %63 : vector<4x256xf32>
    %65 = arith.truncf %64 : vector<4x256xf32> to vector<4x256xbf16>
    %c4 = arith.constant 4 : index
    %c0_28 = arith.constant 0 : index
    %66 = vector.load %arg7[%c4, %c0_28] : memref<36x256xbf16, #tpu.memory_space<vmem>>, vector<4x256xbf16>
    tpu.vector_store %arg7[%c4, %c0_28], %65 {strides = array<i32>} : memref<36x256xbf16, #tpu.memory_space<vmem>>, vector<4x256xbf16>,
    %c15_i32_29 = arith.constant 15 : i32
    %67 = tpu.dynamic_rotate %1 by %c15_i32_29 dim 1 : vector<4x256xf32>, i32 -> vector<4x256xf32>
    %68 = vector.broadcast %25 : vector<1x256xf32> to vector<4x256xf32>
    %69 = arith.mulf %67, %68 : vector<4x256xf32>
    %70 = arith.truncf %69 : vector<4x256xf32> to vector<4x256xbf16>
    %c8 = arith.constant 8 : index
    %c0_30 = arith.constant 0 : index
    %71 = vector.load %arg7[%c8, %c0_30] : memref<36x256xbf16, #tpu.memory_space<vmem>>, vector<4x256xbf16>
    tpu.vector_store %arg7[%c8, %c0_30], %70 {strides = array<i32>} : memref<36x256xbf16, #tpu.memory_space<vmem>>, vector<4x256xbf16>,
    %c1_i32_31 = arith.constant 1 : i32
    %72 = tpu.dynamic_rotate %1 by %c1_i32_31 dim 1 : vector<4x256xf32>, i32 -> vector<4x256xf32>
    %73 = vector.broadcast %30 : vector<1x256xf32> to vector<4x256xf32>
    %74 = arith.mulf %72, %73 : vector<4x256xf32>
    %75 = arith.truncf %74 : vector<4x256xf32> to vector<4x256xbf16>
    %c12 = arith.constant 12 : index
    %c0_32 = arith.constant 0 : index
    %76 = vector.load %arg7[%c12, %c0_32] : memref<36x256xbf16, #tpu.memory_space<vmem>>, vector<4x256xbf16>
    tpu.vector_store %arg7[%c12, %c0_32], %75 {strides = array<i32>} : memref<36x256xbf16, #tpu.memory_space<vmem>>, vector<4x256xbf16>,
    %77 = arith.truncf %1 : vector<4x256xf32> to vector<4x256xbf16>
    %c16 = arith.constant 16 : index
    %c0_33 = arith.constant 0 : index
    %78 = vector.load %arg7[%c16, %c0_33] : memref<36x256xbf16, #tpu.memory_space<vmem>>, vector<4x256xbf16>
    tpu.vector_store %arg7[%c16, %c0_33], %77 {strides = array<i32>} : memref<36x256xbf16, #tpu.memory_space<vmem>>, vector<4x256xbf16>,
    %c255_i32 = arith.constant 255 : i32
    %79 = tpu.dynamic_rotate %1 by %c255_i32 dim 1 : vector<4x256xf32>, i32 -> vector<4x256xf32>
    %80 = vector.broadcast %35 : vector<1x256xf32> to vector<4x256xf32>
    %81 = arith.mulf %79, %80 : vector<4x256xf32>
    %82 = arith.truncf %81 : vector<4x256xf32> to vector<4x256xbf16>
    %c20 = arith.constant 20 : index
    %c0_34 = arith.constant 0 : index
    %83 = vector.load %arg7[%c20, %c0_34] : memref<36x256xbf16, #tpu.memory_space<vmem>>, vector<4x256xbf16>
    tpu.vector_store %arg7[%c20, %c0_34], %82 {strides = array<i32>} : memref<36x256xbf16, #tpu.memory_space<vmem>>, vector<4x256xbf16>,
    %c241_i32 = arith.constant 241 : i32
    %84 = tpu.dynamic_rotate %1 by %c241_i32 dim 1 : vector<4x256xf32>, i32 -> vector<4x256xf32>
    %85 = vector.broadcast %43 : vector<1x256xf32> to vector<4x256xf32>
    %86 = arith.mulf %84, %85 : vector<4x256xf32>
    %87 = arith.truncf %86 : vector<4x256xf32> to vector<4x256xbf16>
    %c24 = arith.constant 24 : index
    %c0_35 = arith.constant 0 : index
    %88 = vector.load %arg7[%c24, %c0_35] : memref<36x256xbf16, #tpu.memory_space<vmem>>, vector<4x256xbf16>
    tpu.vector_store %arg7[%c24, %c0_35], %87 {strides = array<i32>} : memref<36x256xbf16, #tpu.memory_space<vmem>>, vector<4x256xbf16>,
    %c240_i32_36 = arith.constant 240 : i32
    %89 = tpu.dynamic_rotate %1 by %c240_i32_36 dim 1 : vector<4x256xf32>, i32 -> vector<4x256xf32>
    %90 = vector.broadcast %48 : vector<1x256xf32> to vector<4x256xf32>
    %91 = arith.mulf %89, %90 : vector<4x256xf32>
    %92 = arith.truncf %91 : vector<4x256xf32> to vector<4x256xbf16>
    %c28 = arith.constant 28 : index
    %c0_37 = arith.constant 0 : index
    %93 = vector.load %arg7[%c28, %c0_37] : memref<36x256xbf16, #tpu.memory_space<vmem>>, vector<4x256xbf16>
    tpu.vector_store %arg7[%c28, %c0_37], %92 {strides = array<i32>} : memref<36x256xbf16, #tpu.memory_space<vmem>>, vector<4x256xbf16>,
    %c239_i32 = arith.constant 239 : i32
    %94 = tpu.dynamic_rotate %1 by %c239_i32 dim 1 : vector<4x256xf32>, i32 -> vector<4x256xf32>
    %95 = vector.broadcast %56 : vector<1x256xf32> to vector<4x256xf32>
    %96 = arith.mulf %94, %95 : vector<4x256xf32>
    %97 = arith.truncf %96 : vector<4x256xf32> to vector<4x256xbf16>
    %c32 = arith.constant 32 : index
    %c0_38 = arith.constant 0 : index
    %98 = vector.load %arg7[%c32, %c0_38] : memref<36x256xbf16, #tpu.memory_space<vmem>>, vector<4x256xbf16>
    tpu.vector_store %arg7[%c32, %c0_38], %97 {strides = array<i32>} : memref<36x256xbf16, #tpu.memory_space<vmem>>, vector<4x256xbf16>,
    %c0_39 = arith.constant 0 : index
    %c0_40 = arith.constant 0 : index
    %99 = vector.load %arg2[%c0_39, %c0_40] : memref<4x36xbf16, #tpu.memory_space<vmem>>, vector<4x36xbf16>
    %c0_41 = arith.constant 0 : index
    %c0_42 = arith.constant 0 : index
    %100 = vector.load %arg7[%c0_41, %c0_42] : memref<36x256xbf16, #tpu.memory_space<vmem>>, vector<36x256xbf16>
    %cst_43 = arith.constant dense<0.000000e+00> : vector<4x256xf32>
    %101 = tpu.matmul %99, %100, %cst_43 {dimension_numbers = #tpu.dot_dimension_numbers<[1], [0], [0], [1], [0, 0, 1, 1], [], []>} : vector<4x36xbf16>, vector<36x256xbf16>, vector<4x256xf32> -> vector<4x256xf32>
    %c0_44 = arith.constant 0 : index
    %c0_45 = arith.constant 0 : index
    %102 = vector.load %arg4[%c0_44, %c0_45] : memref<4x1xf32, #tpu.memory_space<vmem>>, vector<4x1xf32>
    %103 = vector.broadcast %102 : vector<4x1xf32> to vector<4x256xf32>
    %104 = arith.addf %101, %103 : vector<4x256xf32>
    %cst_46 = arith.constant 0.000000e+00 : f32
    %105 = vector.broadcast %cst_46 : f32 to vector<4x256xf32>
    %106 = arith.maximumf %104, %105 : vector<4x256xf32>
    %c17_i32_47 = arith.constant 17 : i32
    %107 = tpu.dynamic_rotate %106 by %c17_i32_47 dim 1 : vector<4x256xf32>, i32 -> vector<4x256xf32>
    %108 = vector.broadcast %12 : vector<1x256xf32> to vector<4x256xf32>
    %109 = arith.mulf %107, %108 : vector<4x256xf32>
    %110 = arith.truncf %109 : vector<4x256xf32> to vector<4x256xbf16>
    %c0_48 = arith.constant 0 : index
    %c0_49 = arith.constant 0 : index
    %111 = vector.load %arg7[%c0_48, %c0_49] : memref<36x256xbf16, #tpu.memory_space<vmem>>, vector<4x256xbf16>
    tpu.vector_store %arg7[%c0_48, %c0_49], %110 {strides = array<i32>} : memref<36x256xbf16, #tpu.memory_space<vmem>>, vector<4x256xbf16>,
    %c16_i32_50 = arith.constant 16 : i32
    %112 = tpu.dynamic_rotate %106 by %c16_i32_50 dim 1 : vector<4x256xf32>, i32 -> vector<4x256xf32>
    %113 = vector.broadcast %17 : vector<1x256xf32> to vector<4x256xf32>
    %114 = arith.mulf %112, %113 : vector<4x256xf32>
    %115 = arith.truncf %114 : vector<4x256xf32> to vector<4x256xbf16>
    %c4_51 = arith.constant 4 : index
    %c0_52 = arith.constant 0 : index
    %116 = vector.load %arg7[%c4_51, %c0_52] : memref<36x256xbf16, #tpu.memory_space<vmem>>, vector<4x256xbf16>
    tpu.vector_store %arg7[%c4_51, %c0_52], %115 {strides = array<i32>} : memref<36x256xbf16, #tpu.memory_space<vmem>>, vector<4x256xbf16>,
    %c15_i32_53 = arith.constant 15 : i32
    %117 = tpu.dynamic_rotate %106 by %c15_i32_53 dim 1 : vector<4x256xf32>, i32 -> vector<4x256xf32>
    %118 = vector.broadcast %25 : vector<1x256xf32> to vector<4x256xf32>
    %119 = arith.mulf %117, %118 : vector<4x256xf32>
    %120 = arith.truncf %119 : vector<4x256xf32> to vector<4x256xbf16>
    %c8_54 = arith.constant 8 : index
    %c0_55 = arith.constant 0 : index
    %121 = vector.load %arg7[%c8_54, %c0_55] : memref<36x256xbf16, #tpu.memory_space<vmem>>, vector<4x256xbf16>
    tpu.vector_store %arg7[%c8_54, %c0_55], %120 {strides = array<i32>} : memref<36x256xbf16, #tpu.memory_space<vmem>>, vector<4x256xbf16>,
    %c1_i32_56 = arith.constant 1 : i32
    %122 = tpu.dynamic_rotate %106 by %c1_i32_56 dim 1 : vector<4x256xf32>, i32 -> vector<4x256xf32>
    %123 = vector.broadcast %30 : vector<1x256xf32> to vector<4x256xf32>
    %124 = arith.mulf %122, %123 : vector<4x256xf32>
    %125 = arith.truncf %124 : vector<4x256xf32> to vector<4x256xbf16>
    %c12_57 = arith.constant 12 : index
    %c0_58 = arith.constant 0 : index
    %126 = vector.load %arg7[%c12_57, %c0_58] : memref<36x256xbf16, #tpu.memory_space<vmem>>, vector<4x256xbf16>
    tpu.vector_store %arg7[%c12_57, %c0_58], %125 {strides = array<i32>} : memref<36x256xbf16, #tpu.memory_space<vmem>>, vector<4x256xbf16>,
    %127 = arith.truncf %106 : vector<4x256xf32> to vector<4x256xbf16>
    %c16_59 = arith.constant 16 : index
    %c0_60 = arith.constant 0 : index
    %128 = vector.load %arg7[%c16_59, %c0_60] : memref<36x256xbf16, #tpu.memory_space<vmem>>, vector<4x256xbf16>
    tpu.vector_store %arg7[%c16_59, %c0_60], %127 {strides = array<i32>} : memref<36x256xbf16, #tpu.memory_space<vmem>>, vector<4x256xbf16>,
    %c255_i32_61 = arith.constant 255 : i32
    %129 = tpu.dynamic_rotate %106 by %c255_i32_61 dim 1 : vector<4x256xf32>, i32 -> vector<4x256xf32>
    %130 = vector.broadcast %35 : vector<1x256xf32> to vector<4x256xf32>
    %131 = arith.mulf %129, %130 : vector<4x256xf32>
    %132 = arith.truncf %131 : vector<4x256xf32> to vector<4x256xbf16>
    %c20_62 = arith.constant 20 : index
    %c0_63 = arith.constant 0 : index
    %133 = vector.load %arg7[%c20_62, %c0_63] : memref<36x256xbf16, #tpu.memory_space<vmem>>, vector<4x256xbf16>
    tpu.vector_store %arg7[%c20_62, %c0_63], %132 {strides = array<i32>} : memref<36x256xbf16, #tpu.memory_space<vmem>>, vector<4x256xbf16>,
    %c241_i32_64 = arith.constant 241 : i32
    %134 = tpu.dynamic_rotate %106 by %c241_i32_64 dim 1 : vector<4x256xf32>, i32 -> vector<4x256xf32>
    %135 = vector.broadcast %43 : vector<1x256xf32> to vector<4x256xf32>
    %136 = arith.mulf %134, %135 : vector<4x256xf32>
    %137 = arith.truncf %136 : vector<4x256xf32> to vector<4x256xbf16>
    %c24_65 = arith.constant 24 : index
    %c0_66 = arith.constant 0 : index
    %138 = vector.load %arg7[%c24_65, %c0_66] : memref<36x256xbf16, #tpu.memory_space<vmem>>, vector<4x256xbf16>
    tpu.vector_store %arg7[%c24_65, %c0_66], %137 {strides = array<i32>} : memref<36x256xbf16, #tpu.memory_space<vmem>>, vector<4x256xbf16>,
    %c240_i32_67 = arith.constant 240 : i32
    %139 = tpu.dynamic_rotate %106 by %c240_i32_67 dim 1 : vector<4x256xf32>, i32 -> vector<4x256xf32>
    %140 = vector.broadcast %48 : vector<1x256xf32> to vector<4x256xf32>
    %141 = arith.mulf %139, %140 : vector<4x256xf32>
    %142 = arith.truncf %141 : vector<4x256xf32> to vector<4x256xbf16>
    %c28_68 = arith.constant 28 : index
    %c0_69 = arith.constant 0 : index
    %143 = vector.load %arg7[%c28_68, %c0_69] : memref<36x256xbf16, #tpu.memory_space<vmem>>, vector<4x256xbf16>
    tpu.vector_store %arg7[%c28_68, %c0_69], %142 {strides = array<i32>} : memref<36x256xbf16, #tpu.memory_space<vmem>>, vector<4x256xbf16>,
    %c239_i32_70 = arith.constant 239 : i32
    %144 = tpu.dynamic_rotate %106 by %c239_i32_70 dim 1 : vector<4x256xf32>, i32 -> vector<4x256xf32>
    %145 = vector.broadcast %56 : vector<1x256xf32> to vector<4x256xf32>
    %146 = arith.mulf %144, %145 : vector<4x256xf32>
    %147 = arith.truncf %146 : vector<4x256xf32> to vector<4x256xbf16>
    %c32_71 = arith.constant 32 : index
    %c0_72 = arith.constant 0 : index
    %148 = vector.load %arg7[%c32_71, %c0_72] : memref<36x256xbf16, #tpu.memory_space<vmem>>, vector<4x256xbf16>
    tpu.vector_store %arg7[%c32_71, %c0_72], %147 {strides = array<i32>} : memref<36x256xbf16, #tpu.memory_space<vmem>>, vector<4x256xbf16>,
    %c0_73 = arith.constant 0 : index
    %c0_74 = arith.constant 0 : index
    %149 = vector.load %arg3[%c0_73, %c0_74] : memref<4x36xbf16, #tpu.memory_space<vmem>>, vector<4x36xbf16>
    %c0_75 = arith.constant 0 : index
    %c0_76 = arith.constant 0 : index
    %150 = vector.load %arg7[%c0_75, %c0_76] : memref<36x256xbf16, #tpu.memory_space<vmem>>, vector<36x256xbf16>
    %cst_77 = arith.constant dense<0.000000e+00> : vector<4x256xf32>
    %151 = tpu.matmul %149, %150, %cst_77 {dimension_numbers = #tpu.dot_dimension_numbers<[1], [0], [0], [1], [0, 0, 1, 1], [], []>} : vector<4x36xbf16>, vector<36x256xbf16>, vector<4x256xf32> -> vector<4x256xf32>
    %c0_78 = arith.constant 0 : index
    %c0_79 = arith.constant 0 : index
    %152 = vector.load %arg5[%c0_78, %c0_79] : memref<4x1xf32, #tpu.memory_space<vmem>>, vector<4x1xf32>
    %153 = vector.broadcast %152 : vector<4x1xf32> to vector<4x256xf32>
    %154 = arith.addf %151, %153 : vector<4x256xf32>
    %155 = arith.addf %154, %1 : vector<4x256xf32>
    %cst_80 = arith.constant 0.000000e+00 : f32
    %156 = vector.broadcast %cst_80 : f32 to vector<4x256xf32>
    %157 = arith.maximumf %155, %156 : vector<4x256xf32>
    %c0_81 = arith.constant 0 : index
    %c0_82 = arith.constant 0 : index
    %c0_83 = arith.constant 0 : index
    %158 = vector.load %arg6[%c0_81, %c0_82, %c0_83] : memref<1x4x256xf32, #tpu.memory_space<vmem>>, vector<1x4x256xf32>
    %159 = vector.shape_cast %158 : vector<1x4x256xf32> to vector<4x256xf32>
    %160 = vector.shape_cast %157 : vector<4x256xf32> to vector<1x4x256xf32>
    tpu.vector_store %arg6[%c0_81, %c0_82, %c0_83], %160 {strides = array<i32>} : memref<1x4x256xf32, #tpu.memory_space<vmem>>, vector<1x4x256xf32>,
    return
  }
  func.func @transform_0(%arg0: i32) -> (i32, i32, i32) {
    %c0_i32 = arith.constant 0 : i32
    %c0_i32_0 = arith.constant 0 : i32
    %c0_i32_1 = arith.constant 0 : i32
    return %arg0, %c0_i32, %c0_i32_0 : i32, i32, i32
  }
  func.func @transform_1(%arg0: i32) -> (i32, i32) {
    %c0_i32 = arith.constant 0 : i32
    %c0_i32_0 = arith.constant 0 : i32
    %c0_i32_1 = arith.constant 0 : i32
    return %c0_i32, %c0_i32_0 : i32, i32
  }
  func.func @transform_2(%arg0: i32) -> (i32, i32) {
    %c0_i32 = arith.constant 0 : i32
    %c0_i32_0 = arith.constant 0 : i32
    %c0_i32_1 = arith.constant 0 : i32
    return %c0_i32, %c0_i32_0 : i32, i32
  }
  func.func @transform_3(%arg0: i32) -> (i32, i32) {
    %c0_i32 = arith.constant 0 : i32
    %c0_i32_0 = arith.constant 0 : i32
    %c0_i32_1 = arith.constant 0 : i32
    return %c0_i32, %c0_i32_0 : i32, i32
  }
  func.func @transform_4(%arg0: i32) -> (i32, i32) {
    %c0_i32 = arith.constant 0 : i32
    %c0_i32_0 = arith.constant 0 : i32
    %c0_i32_1 = arith.constant 0 : i32
    return %c0_i32, %c0_i32_0 : i32, i32
  }
  func.func @transform_5(%arg0: i32) -> (i32, i32, i32) {
    %c0_i32 = arith.constant 0 : i32
    %c0_i32_0 = arith.constant 0 : i32
    %c0_i32_1 = arith.constant 0 : i32
    return %arg0, %c0_i32, %c0_i32_0 : i32, i32, i32
  }
}

</mosaic_0001>

<bundles_post_ra>
// kernel: tpu_custom_call.1
= control target key start
LH: loop header
LB: loop body
LE: loop exit
PB: predicated region body
PF: predicated region fallthrough
CT: control target
= control target key end

     0   :  { %10 = vsyncpa [#allocation4], 0  ;;  %s1559_s0 = inlined_call_operand.hbm [shape: f32[2,4,256], index: 0, kind: input, shape index: {}]   ;;  %s1560_s1 = inlined_call_operand.vmem [shape: bf16[4,36], index: 1, kind: input, shape index: {}]   ;;  %s1561_s2 = inlined_call_operand.vmem [shape: bf16[4,36], index: 2, kind: input, shape index: {}]   ;;  %s1562_s3 = inlined_call_operand.vmem [shape: f32[4,1], index: 3, kind: input, shape index: {}]   ;;  %s1563_s4 = inlined_call_operand.vmem [shape: f32[4,1], index: 4, kind: input, shape index: {}]   ;;  %s1564_s5 = inlined_call_operand.hbm [shape: f32[2,4,256], index: 5, kind: output, shape index: {}]  }
   0x1   :  { %12 = vsyncpa [#allocation4 + $0x1], 0 }
   0x2   :  { %13 = vsyncpa [#allocation5], 0 }
   0x3   :  { %15 = vsyncpa [#allocation5 + $0x1], 0  ;;  %s1143_s18 = smov 0   ;;  %s1145_s19 = smov 0  }
   0x4   :  { %s1147_s20 = smov 0   ;;  %s1149_s21 = smov 0  }
   0x5 LB: > { %s1164_s22 = sadd.s32 4294967295, %s1099_s21   ;;  %s861_s23 = sadd.s32 4294967294, %s1099_s21   ;;  %s1099_s21 = sphi %s1149_s21, %s1585_s21   ;;  %s1095_s20 = sphi %s1147_s20, %s1584_s20   ;;  %s1091_s19 = sphi %s1145_s19, %s1583_s19   ;;  %s1087_s18 = sphi %s1143_s18, %s1582_s18  }
   0x6   : > { %s1168_s24 = sadd.s32 1, %s1099_s21   ;;  %s28_s25 = sadd.s32 1, %s1095_s20 }
   0x7   : > { %s25_s26 = ssub.s32 %s1099_s21, %s1168_s24  ;;  %p35_p0 = scmp.ne.s32.totalorder %s1095_s20, %s1091_s19 }
   0x8   : > { %p26_p1 = scmp.eq.s32.totalorder %s25_s26, 0  ;;  %p36_p2 = scmp.eq.s32.totalorder %s1099_s21, 0 }
   0x9   : > { %p41_p3 = scmp.ne.s32.totalorder %s1091_s19, %s1087_s18  ;;  %p42_p4 = scmp.eq.s32.totalorder %s1164_s22, 0 }
   0xa   : > { %s1180_s27 = scalar_select %p26_p1, %s1095_s20, %s28_s25  }
   0xb   : > { %p1182_p5 = por %p36_p2, %p35_p0  ;;  %p1186_p6 = por %p42_p4, %p41_p3 }
   0xc   : > { %p149_p7 = scmp.eq.s32.totalorder %s1164_s22, 1  ;;  %p155_p8 = scmp.eq.s32.totalorder %s861_s23, 1 }
   0xd   : > { %p941_p10 = scmp.lt.s32.totalorder %s1099_s21, 2  ;;  %s187_s7 = sand.u32 1, %s1095_s20  }
   0xe   : > { %p1193_p11 = por %p149_p7, %p35_p0  ;;  %p1197_p12 = por %p155_p8, %p41_p3 }
   0xf   : > { %s909_s8 = sshll.u32 %s1099_s21, 7  ;;  %s864_s9 = sshll.u32 %s187_s7, 3 }
  0x10   : > { %s1568_s30 = scalar_select %p1193_p11, 1, 0 }
  0x11   : > { %s1569_s6 = scalar_select %p1197_p12, 1, 0 }
  0x12   : > { %s1206_s12 = scalar_lea.hbm %s1559_s0, %s909_s8  ;;  %s191_s13 = scalar_lea.vmem [#allocation3], %s864_s9 }
  0x13   : > { %s199_s14 = sshll.u32 %s191_s13, 4  ;;  %p1210_p13 = pnand %p941_p10, %p1182_p5  ;;  %s1214_s14 = int_to_ptr.vmem [resolvable:$true] %s199_s14 }
  0x14   : > { %s188_s16 = scalar_lea.sflag [#allocation4], %s187_s7  ;;  %s1003_s17 = scalar_lea.hbm %s1206_s12, 128 }
  0x15   : > { %p1004_p2 = scmp.ne.s32.totalorder %s1206_s12, %s1003_s17  ;;  %p1005_p3 = pneg %p1210_p13 }
  0x16   : > { %s1008_s26 = scalar_lea.hbm %s1559_s0, 256  ;;  %p1009_p5 = scmp.lt.u32.totalorder %s1206_s12, %s1559_s0 }
  0x17   : > { %p1006_p4 = pnand %p1005_p3, %p1004_p2  ;;  %p1010_p8 = scmp.lt.u32.totalorder %s1008_s26, %s1003_s17 }
  0x18   : > { %p1012_p9 = scmp.lt.u32.totalorder %s1003_s17, %s1206_s12 }
  0x19   : > { %p1007_p7 = pneg %p1006_p4  ;;  %p1011_p10 = por %p1010_p8, %p1009_p5 }
  0x1b   : > { %p1013_p0 = por %p1012_p9, %p1011_p10 }
  0x1d   : > { %p1014_p1 = pnand %p1013_p0, %p1007_p7 }
  0x1f   : > { %1017 = shalt.err (!%p1014_p1)
}
  0x20   : > { %s1018_s7 = scalar_lea.vmem %s1214_s14, 128  ;;  %s1101_s9 = smov [#allocation3]  }
  0x21   : > { %p1019_p2 = scmp.ne.s32.totalorder %s1214_s14, %s1018_s7  ;;  %s1023_s10 = sshll.u32 %s1101_s9, 4  ;;  %s1024_s10 = int_to_ptr.vmem [resolvable:$false] %s1023_s10 }
  0x22   : > { %s1025_s11 = scalar_lea.vmem %s1024_s10, 256  ;;  %p1026_p11 = scmp.lt.s32.totalorder %s1214_s14, %s1024_s10 }
  0x23   : > { %p1021_p4 = pnand %p1019_p2, %p1005_p3  ;;  %p1027_p5 = scmp.lt.s32.totalorder %s1025_s11, %s1018_s7 }
  0x25   : > { %p1022_p12 = pneg %p1021_p4  ;;  %p1028_p8 = por %p1027_p5, %p1026_p11 }
  0x27   : > { %p1029_p9 = pnand %p1028_p8, %p1022_p12 }
  0x29   : > { %1032 = shalt.err (!%p1029_p9)
}
  0x2a   : > { %936 = dma.hbm_to_vmem [thread:$0]  (!%p1210_p13), %s1206_s12, 128, %s1214_s14, %s188_s16  }
  0x2b   : > { %p1571_p0 = scmp.lt.s32.totalorder %s1099_s21, 3  ;;  %p1572_p1 = scmp.ge.s32.totalorder %s1099_s21, 1 }
  0x2d   : > { %p205_p3 = pnand %p1572_p1, %p1571_p0 }
  0x2e   : > { %s1248_s13 = sand.u32 (!%p205_p3), 1, %s1091_s19  }
  0x2f   : > { %208 = sbr.rel (%p205_p3) target bundleno = 835 (0x343), region = 40  ;;  %s868_s17 = sshll.u32 (!%p205_p3), %s1248_s13, 3 }
  0x30   : > { %s211_s23 = scalar_lea.sflag (!%p205_p3), [#allocation4], %s1248_s13  ;;  %s214_s15 = scalar_lea.vmem (!%p205_p3), [#allocation3], %s868_s17 }
  0x36   : > { %1078 = dma.done.wait (%p1186_p6), %s211_s23, 128  }
  0x37   : > { %1080 = vsyncadd (%p1186_p6), %s211_s23, 4294967168  ;;  %v1258_v0 = vld [vmem:[%s214_s15] sm:$0xff]  ;;  %s1102_s12 = smov 1   ;;  %s1103_s14 = smov 16   ;;  %v1110_v3 = vmov 0   ;;  %v243_v5 = vlaneseq  ;;  %v1111_v13 = vmov 0.0  }
  0x38   : > { %338 = vrot.lane.b32.xlu1 %v1258_v0, %s1102_s12  ;;  %301 = vrot.lane.b32.xlu0 %v1258_v0, %s1103_s14  ;;  %v1266_v1 = vcombine.high %v1258_v0, %v1258_v0  ;;  %s1104_s16 = smov 17   ;;  %s1105_s29 = smov 15   ;;  %v446_v4 = vld [vmem:[%s1562_s3] sm:$0xf] }
  0x39   : > { %s1106_s25 = smov 127   ;;  %s1107_s26 = smov 112   ;;  %520 = vmatprep.mubr.bf16.mxu0 %v1110_v3  ;;  %985 = vset.pattern.permute.xlu0 %v1110_v3  ;;  %v1301_v6 = vand.u32 127, %v243_v5 }
  0x3a   : > { %v914_v2 = vpack.c.bf16 %v1266_v1, %v1258_v0  ;;  %s1108_s28 = smov 113   ;;  %s1109_s8 = smov 111   ;;  %758 = vmatprep.mubr.bf16.mxu1 %v1110_v3 }
  0x3b   : > { %v1304_v7 = vadd.s32 128, %v1301_v6  ;;  %v246_v8 = vand.u32 15, %v1301_v6  ;;  %vm248_vm2 = vcmp.ge.s32.totalorder %v1301_v6, 16  ;;  %vm342_vm3 = vcmp.lt.s32.totalorder %v1301_v6, 1  ;;  %s777_s7 = scalar_lea.sflag [#allocation5], %s1248_s13  ;;  %p1579_p11 = scmp.ne.s32.totalorder %s1568_s30, 0 }
  0x3c   : > { %283 = vrot.lane.b32.xlu0 %v1258_v0, %s1104_s16  ;;  %340 = vrot.lane.b32.xlu1 %v1266_v1, %s1102_s12  ;;  %365 = vst [vmem:[#allocation2 + $0x10] sm:$0x33] %v914_v2  ;;  %vm287_vm6 = vcmp.lt.s32.totalorder %v1301_v6, 17  ;;  %vm305_vm7 = vcmp.lt.s32.totalorder %v1301_v6, 16  ;;  %v1342_v24 = vsel %vm248_vm2, 1.0, %v1111_v13  ;;  %vm324_vm10 = vcmp.lt.s32.totalorder %v1301_v6, 15 }
  0x3d   : > { %v247_v9 = vand.u32 15, %v1304_v7  ;;  %vm250_vm0 = vcmp.ge.s32.totalorder %v246_v8, 1  ;;  %vm1328_vm5 = vcmp.le.s32.totalorder %v246_v8, 14  ;;  %vm370_vm11 = vcmp.lt.s32.totalorder %v1301_v6, 127 }
  0x3e   : > { %v1320_v15 = vsel %vm250_vm0, 1.0, %v1111_v13  ;;  %vm252_vm4 = vmand %vm248_vm2, %vm250_vm0  ;;  %v1382_v48 = vsel %vm1328_vm5, 1.0, %v1111_v13  ;;  %vm269_vm12 = vcmp.lt.s32.totalorder %v1304_v7, 240  ;;  %vm407_vm13 = vcmp.lt.s32.totalorder %v1301_v6, 112 }
  0x3f   : > { %vm1308_vm1 = vcmp.ge.s32.totalorder %v247_v9, 1  ;;  %v1337_v23 = vsel %vm252_vm4, 1.0, %v1111_v13  ;;  %vm1344_vm8 = vcmp.le.s32.totalorder %v247_v9, 14  ;;  %vm260_vm9 = vmand %vm248_vm2, %vm1328_vm5  ;;  %v1395_v56 = vsel %vm269_vm12, 1.0, %v1111_v13 }
  0x40   : > { %285 = vrot.lane.b32.xlu1 %v1266_v1, %s1104_s16  ;;  %303 = vrot.lane.b32.xlu0 %v1266_v1, %s1103_s14  ;;  %v1317_v14 = vsel %vm1308_vm1, 1.0, %v1111_v13  ;;  %v1365_v37 = vsel %vm260_vm9, 1.0, %v1111_v13  ;;  %v1370_v38 = vsel %vm1344_vm8, 1.0, %v1111_v13  ;;  %vm271_vm14 = vmand %vm269_vm12, %vm1308_vm1  ;;  %vm389_vm15 = vcmp.lt.s32.totalorder %v1301_v6, 113 }
  0x41   : > { %v1408_v2 = vsel %vm271_vm14, 1.0, %v1111_v13  ;;  %vm277_vm0 = vmand %vm269_vm12, %vm1344_vm8  ;;  %vm426_vm1 = vcmp.lt.s32.totalorder %v1301_v6, 111  ;;  %vm481_vm2 = vcmask 1041408   ;;  %vm477_vm4 = vcmask 293888  }
  0x44   : > { %322 = vrot.lane.b32.xlu1 %v1266_v1, %s1105_s29  ;;  %320 = vrot.lane.b32.xlu0 %v1258_v0, %s1105_s29 }
  0x48   : > { %368 = vrot.lane.b32.xlu1 %v1266_v1, %s1106_s25  ;;  %366 = vrot.lane.b32.xlu0 %v1258_v0, %s1106_s25 }
  0x4c   : > { %405 = vrot.lane.b32.xlu1 %v1266_v1, %s1107_s26  ;;  %403 = vrot.lane.b32.xlu0 %v1258_v0, %s1107_s26 }
  0x50   : > { %387 = vrot.lane.b32.xlu1 %v1266_v1, %s1108_s28  ;;  %385 = vrot.lane.b32.xlu0 %v1258_v0, %s1108_s28 }
  0x54   : > { %424 = vrot.lane.b32.xlu1 %v1266_v1, %s1109_s8  ;;  %422 = vrot.lane.b32.xlu0 %v1258_v0, %s1109_s8 }
  0x58   : > { %449 = vperm.xlu0 %985, %v446_v4  }
  0xaa   : > { %v339_v10 = vpop.permute.xlu1 %338  ;;  %v302_v11 = vpop.permute.xlu0 %301 }
  0xae   : > { %v284_v16 = vpop.permute.xlu0 %283  ;;  %v341_v17 = vpop.permute.xlu1 %340 }
  0xaf   : > { %v343_v18 = vsel %vm342_vm3, %v339_v10, %v341_v17  ;;  %v344_v19 = vsel %vm342_vm3, %v341_v17, %v339_v10 }
  0xb0   : > { %v345_v21 = vmul.f32 %v344_v19, %v1320_v15  ;;  %v346_v22 = vmul.f32 %v343_v18, %v1317_v14  ;;  %v1422_v18 = vsel %vm277_vm0, 1.0, %v1111_v13 }
  0xb2   : > { %v913_v25 = vpack.c.bf16 %v346_v22, %v345_v21  ;;  %v286_v26 = vpop.permute.xlu1 %285  ;;  %v304_v27 = vpop.permute.xlu0 %303 }
  0xb3   : > { %v288_v29 = vsel %vm287_vm6, %v284_v16, %v286_v26  ;;  %v289_v30 = vsel %vm287_vm6, %v286_v26, %v284_v16  ;;  %v307_v31 = vsel %vm305_vm7, %v304_v27, %v302_v11  ;;  %v306_v36 = vsel %vm305_vm7, %v302_v11, %v304_v27 }
  0xb4   : > { %v354_v32 = vrot.slane %v913_v25, 6  ;;  %v290_v33 = vmul.f32 %v289_v30, %v1337_v23  ;;  %v291_v34 = vmul.f32 %v288_v29, %v1317_v14  ;;  %v308_v35 = vmul.f32 %v307_v31, %v1342_v24 }
  0xb6   : > { %356 = vst [vmem:[#allocation2 + $0x8] sm:$0xcc] %v354_v32  ;;  %v910_v39 = vpack.c.bf16 %v291_v34, %v290_v33  ;;  %v911_v40 = vpack.c.bf16 %v306_v36, %v308_v35  ;;  %v323_v41 = vpop.permute.xlu1 %322  ;;  %v321_v42 = vpop.permute.xlu0 %320  ;;  %v440_v33 = vld [vmem:[%s1560_s1] sm:$0x3] }
  0xb7   : > { %v325_v43 = vsel %vm324_vm10, %v321_v42, %v323_v41  ;;  %v326_v44 = vsel %vm324_vm10, %v323_v41, %v321_v42 }
  0xb8   : > { %300 = vst [vmem:[#allocation2] sm:$0x33] %v910_v39  ;;  %v317_v45 = vrot.slane %v911_v40, 6  ;;  %v327_v46 = vmul.f32 %v326_v44, %v1365_v37  ;;  %v328_v47 = vmul.f32 %v325_v43, %v1370_v38 }
  0xba   : > { %319 = vst [vmem:[#allocation2] sm:$0xcc] %v317_v45  ;;  %v912_v49 = vpack.c.bf16 %v328_v47, %v327_v46  ;;  %v369_v50 = vpop.permute.xlu1 %368  ;;  %v367_v51 = vpop.permute.xlu0 %366  ;;  %v686_v46 = vld [vmem:[%s1563_s4] sm:$0xf] }
  0xbb   : > { %v371_v52 = vsel %vm370_vm11, %v367_v51, %v369_v50  ;;  %v372_v53 = vsel %vm370_vm11, %v369_v50, %v367_v51 }
  0xbc   : > { %337 = vst [vmem:[#allocation2 + $0x8] sm:$0x33] %v912_v49  ;;  %v373_v54 = vmul.f32 %v371_v52, %v1382_v48  ;;  %v374_v55 = vmul.f32 %v372_v53, %v1370_v38 }
  0xbe   : > { %v915_v57 = vpack.c.bf16 %v374_v55, %v373_v54  ;;  %v406_v58 = vpop.permute.xlu1 %405  ;;  %v404_v59 = vpop.permute.xlu0 %403 }
  0xbf   : > { %v409_v60 = vsel %vm407_vm13, %v406_v58, %v404_v59  ;;  %v408_v63 = vsel %vm407_vm13, %v404_v59, %v406_v58 }
  0xc0   : > { %v382_v61 = vrot.slane %v915_v57, 6  ;;  %v411_v62 = vmul.f32 %v409_v60, %v1395_v56 }
  0xc2   : > { %384 = vst [vmem:[#allocation2 + $0x10] sm:$0xcc] %v382_v61  ;;  %v917_v3 = vpack.c.bf16 %v411_v62, %v408_v63  ;;  %v388_v4 = vpop.permute.xlu1 %387  ;;  %v386_v5 = vpop.permute.xlu0 %385 }
  0xc3   : > { %v390_v8 = vsel %vm389_vm15, %v386_v5, %v388_v4  ;;  %v391_v9 = vsel %vm389_vm15, %v388_v4, %v386_v5  ;;  %v987_v10 = vld [vmem:[#allocation2 + $0x4] ss:$8 sps:$4 sm:$0xff]   ;;  %v989_v11 = vld [vmem:[#allocation2] ss:$8 sps:$4 sm:$0xff]  }
  0xc4   : > { %v419_v12 = vrot.slane %v917_v3, 6  ;;  %v392_v16 = vmul.f32 %v390_v8, %v1320_v15  ;;  %v393_v17 = vmul.f32 %v391_v9, %v1408_v2  ;;  %488 = vmatprep.subr.bf16.mxu0 %v987_v10 }
  0xc5   : > { %489 = vmatpush1.bf16.msra.mxu0 %v989_v11 }
  0xc6   : > { %421 = vst [vmem:[#allocation2 + $0x18] sm:$0xcc] %v419_v12  ;;  %v916_v7 = vpack.c.bf16 %v393_v17, %v392_v16  ;;  %v425_v19 = vpop.permute.xlu1 %424  ;;  %v423_v20 = vpop.permute.xlu0 %422 }
  0xc7   : > { %v427_v21 = vsel %vm426_vm1, %v423_v20, %v425_v19  ;;  %v428_v22 = vsel %vm426_vm1, %v425_v19, %v423_v20 }
  0xc8   : > { %402 = vst [vmem:[#allocation2 + $0x18] sm:$0x33] %v916_v7  ;;  %v429_v25 = vmul.f32 %v427_v21, %v1382_v48  ;;  %v430_v26 = vmul.f32 %v428_v22, %v1422_v18 }
  0xca   : > { %v918_v27 = vpack.c.bf16 %v430_v26, %v429_v25 }
  0xcc   : > { %439 = vst [vmem:[#allocation2 + $0x20] sm:$0x33] %v918_v27 }
  0xcf   : > { %v990_v13 = vld [vmem:[#allocation2 + $0x14] ss:$8 sps:$4 sm:$0xff]   ;;  %v992_v28 = vld [vmem:[#allocation2 + $0x10] ss:$8 sps:$4 sm:$0xff]  }
  0xd0   : > { %490 = vmatprep.subr.bf16.mxu0 %v990_v13 }
  0xd1   : > { %491 = vmatpush1.bf16.msra.mxu0 %v992_v28 }
  0xd3   : > { %v445_v29 = vld [vmem:[#allocation2 + $0x20] sm:$0x33] }
  0xd4   : > { %v884_v30 = vcombine.high %v445_v29, %v445_v29  ;;  %v883_v31 = vcombine.low %v445_v29, %v445_v29 }
  0xd6   : > { %885 = vmatprep.subr.msk.bf16.mxu0 %vm481_vm2, %v884_v30  ;;  %v483_v32 = vsel %vm481_vm2, %v883_v31, 0 }
  0xd7   : > { %493 = vmatpush1.bf16.msra.mxu0 %v483_v32  ;;  %v450_v34 = vpop.permute.xlu0 %449 }
  0xda   : > { %886 = vmatmul.mubr.msk.bf16.vlgmr.msra.gmra.mrb[0].mxu0 %vm477_vm4, %v440_v33 }
 0x1ad   : > { %v522_v35 = vpop.f32.mrb[0].mxu0 }
 0x1ae   : > { %v523_v36 = vadd.f32 %v522_v35, %v450_v34  ;;  %v524_v39 = vpop.f32.mrb[1].mxu0 }
 0x1af   : > { %v525_v40 = vadd.f32 %v524_v39, %v450_v34  ;;  %v526_v41 = vpop.f32.mrb[2].mxu0 }
 0x1b0   : > { %v529_v42 = vmax.f32 %v523_v36, 0.0  ;;  %v527_v43 = vpop.f32.mrb[3].mxu0 }
 0x1b1   : > { %v530_v44 = vmax.f32 %v525_v40, 0.0 }
 0x1b2   : > { %583 = vrot.lane.b32.xlu0 %v529_v42, %s1102_s12  ;;  %548 = vrot.lane.b32.xlu1 %v529_v42, %s1103_s14 }
 0x1b3   : > { %v923_v45 = vpack.c.bf16 %v530_v44, %v529_v42 }
 0x1b5   : > { %609 = vst [vmem:[#allocation2 + $0x10] sm:$0x33] %v923_v45 }
 0x1b6   : > { %531 = vrot.lane.b32.xlu0 %v529_v42, %s1104_s16  ;;  %550 = vrot.lane.b32.xlu1 %v530_v44, %s1103_s14 }
 0x1ba   : > { %566 = vrot.lane.b32.xlu0 %v529_v42, %s1105_s29  ;;  %585 = vrot.lane.b32.xlu1 %v530_v44, %s1102_s12 }
 0x1be   : > { %610 = vrot.lane.b32.xlu0 %v529_v42, %s1106_s25  ;;  %533 = vrot.lane.b32.xlu1 %v530_v44, %s1104_s16  ;;  %s928_s16 = sshll.u32 %s1164_s22, 7  ;;  %s1112_s22 = smov [#allocation6]  }
 0x1c2   : > { %645 = vrot.lane.b32.xlu0 %v529_v42, %s1107_s26  ;;  %568 = vrot.lane.b32.xlu1 %v530_v44, %s1105_s29  ;;  %s240_s29 = scalar_lea.vmem [#allocation6], %s868_s17  ;;  %s1037_s17 = sshll.u32 %s1112_s22, 4  ;;  %s1038_s17 = int_to_ptr.vmem [resolvable:$false] %s1037_s17 }
 0x1c3   : > { %s1039_s10 = scalar_lea.vmem %s1038_s17, 256 }
 0x1c6   : > { %628 = vrot.lane.b32.xlu0 %v529_v42, %s1108_s28  ;;  %612 = vrot.lane.b32.xlu1 %v530_v44, %s1106_s25  ;;  %s791_s25 = sshll.u32 %s240_s29, 4  ;;  %s1517_s25 = int_to_ptr.vmem [resolvable:$true] %s791_s25 }
 0x1c7   : > { %s1033_s9 = scalar_lea.vmem %s1517_s25, 128  ;;  %p1040_p7 = scmp.lt.s32.totalorder %s1517_s25, %s1038_s17 }
 0x1c8   : > { %p1034_p6 = scmp.ne.s32.totalorder %s1517_s25, %s1033_s9  ;;  %p1041_p10 = scmp.lt.s32.totalorder %s1039_s10, %s1033_s9 }
 0x1ca   : > { %663 = vrot.lane.b32.xlu0 %v529_v42, %s1109_s8  ;;  %647 = vrot.lane.b32.xlu1 %v530_v44, %s1107_s26  ;;  %p1035_p12 = pnand %p1034_p6, %p1579_p11  ;;  %p1042_p2 = por %p1041_p10, %p1040_p7 }
 0x1cc   : > { %p1036_p13 = pneg %p1035_p12 }
 0x1ce   : > { %689 = vperm.xlu0 %985, %v686_v46   ;;  %630 = vrot.lane.b32.xlu1 %v530_v44, %s1108_s28  ;;  %p1043_p4 = pnand %p1042_p2, %p1036_p13 }
 0x1d2   : > { %665 = vrot.lane.b32.xlu1 %v530_v44, %s1109_s8  ;;  %s1515_s8 = scalar_lea.hbm %s1564_s5, %s928_s16 }
 0x224   : > { %v584_v47 = vpop.permute.xlu0 %583  ;;  %v549_v49 = vpop.permute.xlu1 %548 }
 0x228   : > { %v532_v50 = vpop.permute.xlu0 %531  ;;  %v551_v51 = vpop.permute.xlu1 %550 }
 0x229   : > { %v553_v52 = vsel %vm305_vm7, %v551_v51, %v549_v49  ;;  %v552_v54 = vsel %vm305_vm7, %v549_v49, %v551_v51 }
 0x22a   : > { %v554_v53 = vmul.f32 %v553_v52, %v1342_v24 }
 0x22c   : > { %v920_v55 = vpack.c.bf16 %v552_v54, %v554_v53  ;;  %v567_v57 = vpop.permute.xlu0 %566  ;;  %v586_v58 = vpop.permute.xlu1 %585 }
 0x22d   : > { %v587_v59 = vsel %vm342_vm3, %v584_v47, %v586_v58  ;;  %v588_v60 = vsel %vm342_vm3, %v586_v58, %v584_v47 }
 0x22e   : > { %v563_v61 = vrot.slane %v920_v55, 6  ;;  %v589_v62 = vmul.f32 %v588_v60, %v1320_v15  ;;  %v590_v63 = vmul.f32 %v587_v59, %v1317_v14 }
 0x230   : > { %565 = vst [vmem:[#allocation2] sm:$0xcc] %v563_v61  ;;  %v922_v3 = vpack.c.bf16 %v590_v63, %v589_v62  ;;  %v534_v24 = vpop.permute.xlu1 %533  ;;  %v611_v9 = vpop.permute.xlu0 %610 }
 0x231   : > { %v535_v4 = vsel %vm287_vm6, %v532_v50, %v534_v24  ;;  %v536_v5 = vsel %vm287_vm6, %v534_v24, %v532_v50 }
 0x232   : > { %v598_v8 = vrot.slane %v922_v3, 6  ;;  %v537_v10 = vmul.f32 %v536_v5, %v1337_v23  ;;  %v538_v11 = vmul.f32 %v535_v4, %v1317_v14 }
 0x234   : > { %600 = vst [vmem:[#allocation2 + $0x8] sm:$0xcc] %v598_v8  ;;  %v919_v12 = vpack.c.bf16 %v538_v11, %v537_v10  ;;  %v569_v16 = vpop.permute.xlu1 %568  ;;  %v646_v21 = vpop.permute.xlu0 %645 }
 0x235   : > { %v570_v17 = vsel %vm324_vm10, %v567_v57, %v569_v16  ;;  %v571_v7 = vsel %vm324_vm10, %v569_v16, %v567_v57 }
 0x236   : > { %547 = vst [vmem:[#allocation2] sm:$0x33] %v919_v12  ;;  %v572_v19 = vmul.f32 %v571_v7, %v1365_v37  ;;  %v573_v20 = vmul.f32 %v570_v17, %v1370_v38 }
 0x238   : > { %v921_v22 = vpack.c.bf16 %v573_v20, %v572_v19  ;;  %v613_v25 = vpop.permute.xlu1 %612  ;;  %v629_v29 = vpop.permute.xlu0 %628 }
 0x239   : > { %v614_v14 = vsel %vm370_vm11, %v611_v9, %v613_v25  ;;  %v615_v23 = vsel %vm370_vm11, %v613_v25, %v611_v9 }
 0x23a   : > { %582 = vst [vmem:[#allocation2 + $0x8] sm:$0x33] %v921_v22  ;;  %v616_v26 = vmul.f32 %v614_v14, %v1382_v48  ;;  %v617_v27 = vmul.f32 %v615_v23, %v1370_v38 }
 0x23c   : > { %v924_v13 = vpack.c.bf16 %v617_v27, %v616_v26  ;;  %v648_v28 = vpop.permute.xlu1 %647 }
 0x23d   : > { %v650_v37 = vsel %vm407_vm13, %v648_v28, %v646_v21  ;;  %v649_v32 = vsel %vm407_vm13, %v646_v21, %v648_v28 }
 0x23e   : > { %v625_v30 = vrot.slane %v924_v13, 6  ;;  %v652_v31 = vmul.f32 %v650_v37, %v1395_v56  ;;  %v664_v56 = vpop.permute.xlu0 %663 }
 0x240   : > { %627 = vst [vmem:[#allocation2 + $0x10] sm:$0xcc] %v625_v30  ;;  %v926_v33 = vpack.c.bf16 %v652_v31, %v649_v32  ;;  %v631_v34 = vpop.permute.xlu1 %630 }
 0x241   : > { %v632_v35 = vsel %vm389_vm15, %v629_v29, %v631_v34  ;;  %v633_v38 = vsel %vm389_vm15, %v631_v34, %v629_v29  ;;  %v995_v36 = vld [vmem:[#allocation2 + $0x4] ss:$8 sps:$4 sm:$0xff]   ;;  %v997_v39 = vld [vmem:[#allocation2] ss:$8 sps:$4 sm:$0xff]  }
 0x242   : > { %v660_v40 = vrot.slane %v926_v33, 6  ;;  %v634_v41 = vmul.f32 %v632_v35, %v1320_v15  ;;  %v635_v42 = vmul.f32 %v633_v38, %v1408_v2  ;;  %726 = vmatprep.subr.bf16.mxu1 %v995_v36 }
 0x243   : > { %727 = vmatpush1.bf16.msra.mxu1 %v997_v39 }
 0x244   : > { %662 = vst [vmem:[#allocation2 + $0x18] sm:$0xcc] %v660_v40  ;;  %v925_v43 = vpack.c.bf16 %v635_v42, %v634_v41  ;;  %v666_v44 = vpop.permute.xlu1 %665 }
 0x245   : > { %v667_v45 = vsel %vm426_vm1, %v664_v56, %v666_v44  ;;  %v668_v46 = vsel %vm426_vm1, %v666_v44, %v664_v56 }
 0x246   : > { %644 = vst [vmem:[#allocation2 + $0x18] sm:$0x33] %v925_v43  ;;  %v669_v47 = vmul.f32 %v667_v45, %v1382_v48  ;;  %v670_v49 = vmul.f32 %v668_v46, %v1422_v18  ;;  %v680_v48 = vld [vmem:[%s1561_s2] sm:$0x3] }
 0x248   : > { %v927_v15 = vpack.c.bf16 %v670_v49, %v669_v47 }
 0x24a   : > { %679 = vst [vmem:[#allocation2 + $0x20] sm:$0x33] %v927_v15 }
 0x24d   : > { %v998_v2 = vld [vmem:[#allocation2 + $0x14] ss:$8 sps:$4 sm:$0xff]   ;;  %v1000_v50 = vld [vmem:[#allocation2 + $0x10] ss:$8 sps:$4 sm:$0xff]   ;;  %v690_v18 = vpop.permute.xlu0 %689 }
 0x24e   : > { %728 = vmatprep.subr.bf16.mxu1 %v998_v2 }
 0x24f   : > { %729 = vmatpush1.bf16.msra.mxu1 %v1000_v50 }
 0x251   : > { %v685_v51 = vld [vmem:[#allocation2 + $0x20] sm:$0x33] }
 0x252   : > { %v901_v52 = vcombine.high %v685_v51, %v685_v51  ;;  %v900_v53 = vcombine.low %v685_v51, %v685_v51 }
 0x254   : > { %902 = vmatprep.subr.msk.bf16.mxu1 %vm481_vm2, %v901_v52  ;;  %v721_v6 = vsel %vm481_vm2, %v900_v53, 0 }
 0x255   : > { %731 = vmatpush1.bf16.msra.mxu1 %v721_v6 }
 0x258   : > { %903 = vmatmul.mubr.msk.bf16.vlgmr.msra.gmra.mrb[0].mxu1 %vm477_vm4, %v680_v48 }
 0x32b   : > { %v760_v54 = vpop.f32.mrb[0].mxu1 }
 0x32c   : > { %v761_v55 = vadd.f32 %v760_v54, %v690_v18  ;;  %v762_v57 = vpop.f32.mrb[1].mxu1 }
 0x32d   : > { %v763_v58 = vadd.f32 %v762_v57, %v690_v18  ;;  %v764_v59 = vpop.f32.mrb[2].mxu1 }
 0x32e   : > { %v767_v60 = vadd.f32 %v761_v55, %v1258_v0  ;;  %v765_v61 = vpop.f32.mrb[3].mxu1 }
 0x32f   : > { %v768_v62 = vadd.f32 %v763_v58, %v1266_v1 }
 0x330   : > { %v769_v63 = vmax.f32 %v767_v60, 0.0 }
 0x331   : > { %v770_v3 = vmax.f32 %v768_v62, 0.0 }
 0x333   : > { %v773_v24 = vcombine.low %v769_v63, %v770_v3 }
 0x335   : > { %775 = vst [vmem:[%s240_s29] sm:$0xff] %v773_v24 }
 0x336   : > { %1046 = shalt.err (!%p1043_p4)
}
 0x337   : > { %s1047_s13 = scalar_lea.hbm %s1515_s8, 128  ;;  %s1051_s15 = scalar_lea.hbm %s1564_s5, 256 }
 0x338   : > { %p1048_p5 = scmp.ne.s32.totalorder %s1515_s8, %s1047_s13  ;;  %p1052_p0 = scmp.lt.u32.totalorder %s1515_s8, %s1564_s5 }
 0x339   : > { %p1053_p1 = scmp.lt.u32.totalorder %s1051_s15, %s1047_s13  ;;  %p1055_p6 = scmp.lt.u32.totalorder %s1047_s13, %s1515_s8 }
 0x33a   : > { %p1049_p8 = pnand %p1048_p5, %p1579_p11 }
 0x33b   : > { %p1054_p3 = por %p1053_p1, %p1052_p0 }
 0x33c   : > { %p1050_p9 = pneg %p1049_p8 }
 0x33d   : > { %p1056_p12 = por %p1055_p6, %p1054_p3 }
 0x33f   : > { %p1057_p13 = pnand %p1056_p12, %p1050_p9 }
 0x341   : > { %1060 = shalt.err (!%p1057_p13)
}
 0x342   : > { %931 = dma.vmem_to_hbm [thread:$0]  (%p1579_p11), %s1517_s25, 128, %s1515_s8, %s777_s7  }
 0x343 PF: > { %s803_s16 = sand.u32 1, %s1087_s18   ;;  %p1580_p7 = scmp.ne.s32.totalorder %s1569_s6, 0 }
 0x344   : > { %p1581_p10 = scmp.ge.s32.totalorder %s1099_s21, 2  ;;  %s804_s29 = scalar_lea.sflag [#allocation5], %s803_s16 }
 0x346   : > { %p938_p2 = pnand %p1581_p10, %p1580_p7 }
 0x348   : > { %1082 = dma.done.wait (!%p938_p2), %s804_s29, 128  }
 0x349   : > { %1084 = vsyncadd (!%p938_p2), %s804_s29, 4294967168  ;;  %p18_p4 = scmp.ge.s32.totalorder %s1168_s24, 4   ;;  %s1582_s18 = smov %s1091_s19 }
 0x34a   : > { %s1583_s19 = smov %s1095_s20  ;;  %s1584_s20 = smov %s1180_s27 }
 0x34b   : > { %s1585_s21 = smov %s1168_s24  ;;  %20 = sbr.rel (!%p18_p4) target bundleno = 5 (0x5), region = 85 }
 0x352   :  { %809 = vsyncpa [#allocation4], 1 }
 0x353   :  { %811 = vsyncpa [#allocation4 + $0x1], 1 }
 0x354   :  { %812 = vsyncpa [#allocation5], 1 }
 0x355   :  { %814 = vsyncpa [#allocation5 + $0x1], 1 }

</bundles_post_ra>
